<compile_context>
chip_gen: v7x
topology: tpu7x:2x2x1
jax: 0.10.0
libtpu: 0.0.40
codegen_flags: <defaults>
</compile_context>

<pallas_src>
import functools

import jax
import jax.numpy as jnp
from jax.experimental import pallas as pl
from jax.experimental.pallas import tpu as pltpu

D_IN, D_H, D_OUT = 100, 256, 784
D_IN_PAD = 128          # layer-1 K padded to one full lane group


# ---------------------------------------------------------------------------
# Chip heuristics (static, trace-time only)
# ---------------------------------------------------------------------------
def _device_kind():
    try:
        return jax.devices()[0].device_kind.lower()
    except Exception:
        return ""


def _num_tensorcores():
    # v7x has 2 TensorCores per chip sharded via the "parallel" grid axis.
    return 2 if "v7" in _device_kind() else 1


def _use_bf16_tanh():
    # v6e / v7x EUP handles packed bf16 (~2x f32 rate); keep f32 elsewhere.
    k = _device_kind()
    return ("v6" in k) or ("v7" in k)


def _round_up(x, m):
    return ((x + m - 1) // m) * m


def _choose_tb(batch, num_tc):
    """Pick the batch tile.

    * multiples of 16 (bf16 sublane packing for the x tile)
    * >=2 grid steps on v7x for mid-size batches (both TCs busy)
    * 512-row tiles for very large batches (amortize per-step overhead)
    * single 256-row tile otherwise (v5e/v6e: 1 TC, mem-bound already)
    """
    if batch >= 1024:
        return 512
    if num_tc >= 2 and batch > 16:
        half = (batch + 1) // 2
        return min(256, max(16, _round_up(half, 16)))
    return min(256, max(16, _round_up(batch, 16)))


# ---------------------------------------------------------------------------
# Kernel
# ---------------------------------------------------------------------------
def _generator_kernel(x_ref, w1_ref, b1_ref, w2_ref, b2_ref, w3_ref, b3_ref,
                      o_ref, *, bf16_tanh):
    # x tile: (TB, 128) bf16 (already cast + K-padded in the wrapper).
    x = x_ref[...]

    # Layer 1: Linear(128(pad) -> 256) + ReLU   (f32 accumulation / bias / relu)
    h1 = jnp.dot(x, w1_ref[...], preferred_element_type=jnp.float32)
    h1 = jnp.maximum(h1 + b1_ref[...], 0.0)

    # Layer 2: Linear(256 -> 256) + ReLU
    h2 = jnp.dot(h1.astype(jnp.bfloat16), w2_ref[...],
                 preferred_element_type=jnp.float32)
    h2 = jnp.maximum(h2 + b2_ref[...], 0.0)

    # Layer 3: Linear(256 -> 784) + Tanh
    h3 = jnp.dot(h2.astype(jnp.bfloat16), w3_ref[...],
                 preferred_element_type=jnp.float32)
    h3 = h3 + b3_ref[...]
    if bf16_tanh:
        o_ref[...] = jnp.tanh(h3.astype(jnp.bfloat16)).astype(o_ref.dtype)
    else:
        o_ref[...] = jnp.tanh(h3).astype(o_ref.dtype)


# ---------------------------------------------------------------------------
# Wrapper
# ---------------------------------------------------------------------------
def prepare_params(params):
    """One-time prep: pad layer-1 K (100->128) and cast weights to bf16.
    Biases stay f32."""
    w1, b1, w2, b2, w3, b3 = params
    w1p = jnp.pad(w1, ((0, D_IN_PAD - D_IN), (0, 0))).astype(jnp.bfloat16)
    w2b = w2.astype(jnp.bfloat16)
    w3b = w3.astype(jnp.bfloat16)
    return (w1p, b1, w2b, b2, w3b, b3)


def generator_forward(x, prep_params):
    """x: (B, 100) float32. prep_params from prepare_params().
    Returns (B, 784) float32."""
    w1p, b1, w2b, b2, w3b, b3 = prep_params
    B = x.shape[0]

    num_tc = _num_tensorcores()
    TB = _choose_tb(B, num_tc)
    grid = (pl.cdiv(B, TB),)

    # Fused pad (100 -> 128 K dim) + bf16 cast for x; single pass over x.
    x_p = jnp.pad(x, ((0, 0), (0, D_IN_PAD - D_IN))).astype(jnp.bfloat16)

    kernel = functools.partial(_generator_kernel, bf16_tanh=_use_bf16_tanh())

    out = pl.pallas_call(
        kernel,
        out_shape=jax.ShapeDtypeStruct((B, D_OUT), jnp.float32),
        grid_spec=pltpu.PrefetchScalarGridSpec(
            num_scalar_prefetch=0,
            grid=grid,
            in_specs=[
                pl.BlockSpec((TB, D_IN_PAD), lambda i: (i, 0)),     # x tile
                pl.BlockSpec((D_IN_PAD, D_H), lambda i: (0, 0)),    # W1 (full)
                pl.BlockSpec((1, D_H), lambda i: (0, 0)),           # b1
                pl.BlockSpec((D_H, D_H), lambda i: (0, 0)),         # W2 (full)
                pl.BlockSpec((1, D_H), lambda i: (0, 0)),           # b2
                pl.BlockSpec((D_H, D_OUT), lambda i: (0, 0)),       # W3 (full)
                pl.BlockSpec((1, D_OUT), lambda i: (0, 0)),         # b3
            ],
            out_specs=pl.BlockSpec((TB, D_OUT), lambda i: (i, 0)),
        ),
        compiler_params=pltpu.CompilerParams(
            dimension_semantics=("parallel",)),
    )(x_p, w1p, b1, w2b, b2, w3b, b3)

    return out


def init_params(key):
    """Deterministic init mimicking nn.Linear default (uniform +/- 1/sqrt(fan_in)).
    Weights stored as (in_features, out_features), f32."""
    ks = jax.random.split(key, 6)

    def lin(kw, kb, fan_in, fan_out):
        bound = 1.0 / jnp.sqrt(jnp.float32(fan_in))
        w = jax.random.uniform(kw, (fan_in, fan_out), jnp.float32,
                               minval=-bound, maxval=bound)
        b = jax.random.uniform(kb, (1, fan_out), jnp.float32,
                               minval=-bound, maxval=bound)
        return w, b

    w1, b1 = lin(ks[0], ks[1], D_IN, D_H)
    w2, b2 = lin(ks[2], ks[3], D_H, D_H)
    w3, b3 = lin(ks[4], ks[5], D_H, D_OUT)
    return (w1, b1, w2, b2, w3, b3)


if __name__ == "__main__":
    key = jax.random.PRNGKey(0)
    kp, kx = jax.random.split(key)
    params = init_params(kp)
    prep = prepare_params(params)          # one-time pad + bf16 cast

    batch = 2
    x = jax.random.normal(kx, (batch, D_IN), dtype=jnp.float32)

    out = generator_forward(x, prep)
    out = jax.block_until_ready(out)

    # Pure-JAX f32 reference (kernel uses bf16 MXU operands -> loose tolerance).
    w1, b1, w2, b2, w3, b3 = params
    ref = jnp.tanh(
        jnp.maximum(jnp.maximum(x @ w1 + b1, 0.0) @ w2 + b2, 0.0) @ w3 + b3)
    assert out.shape == (batch, D_OUT)
    assert jnp.allclose(out, ref, atol=3e-2, rtol=3e-2)

    print("KERNEL_OK")
</pallas_src>

<mosaic_0001>
module attributes {stable_mosaic.version = 11 : i64} {
  func.func @_generator_kernel(%arg0: i32, %arg1: memref<16x128xbf16, #tpu.memory_space<vmem>>, %arg2: memref<128x256xbf16, #tpu.memory_space<vmem>>, %arg3: memref<1x256xf32, #tpu.memory_space<vmem>>, %arg4: memref<256x256xbf16, #tpu.memory_space<vmem>>, %arg5: memref<1x256xf32, #tpu.memory_space<vmem>>, %arg6: memref<256x784xbf16, #tpu.memory_space<vmem>>, %arg7: memref<1x784xf32, #tpu.memory_space<vmem>>, %arg8: memref<16x784xf32, #tpu.memory_space<vmem>>) attributes {dimension_semantics = [#tpu.dimension_semantics<parallel>], iteration_bounds = array<i64: 1>, scalar_prefetch = 0 : i64, scratch_operands = 0 : i64, tpu.core_type = #tpu.core_type<tc>, window_params = [{transform_indices = @transform_0, window_bounds = array<i64: 16, 128>}, {pipeline_mode = #tpu.pipeline_mode<synchronous>, transform_indices = @transform_1, window_bounds = array<i64: 128, 256>}, {pipeline_mode = #tpu.pipeline_mode<synchronous>, transform_indices = @transform_2, window_bounds = array<i64: 1, 256>}, {pipeline_mode = #tpu.pipeline_mode<synchronous>, transform_indices = @transform_3, window_bounds = array<i64: 256, 256>}, {pipeline_mode = #tpu.pipeline_mode<synchronous>, transform_indices = @transform_4, window_bounds = array<i64: 1, 256>}, {pipeline_mode = #tpu.pipeline_mode<synchronous>, transform_indices = @transform_5, window_bounds = array<i64: 256, 784>}, {pipeline_mode = #tpu.pipeline_mode<synchronous>, transform_indices = @transform_6, window_bounds = array<i64: 1, 784>}, {transform_indices = @transform_7, window_bounds = array<i64: 16, 784>}]} {
    %c0 = arith.constant 0 : index
    %c0_0 = arith.constant 0 : index
    %0 = vector.load %arg1[%c0, %c0_0] : memref<16x128xbf16, #tpu.memory_space<vmem>>, vector<16x128xbf16>
    %c0_1 = arith.constant 0 : index
    %c0_2 = arith.constant 0 : index
    %1 = vector.load %arg2[%c0_1, %c0_2] : memref<128x256xbf16, #tpu.memory_space<vmem>>, vector<128x256xbf16>
    %cst = arith.constant dense<0.000000e+00> : vector<16x256xf32>
    %2 = tpu.matmul %0, %1, %cst {dimension_numbers = #tpu.dot_dimension_numbers<[1], [0], [0], [1], [0, 0, 1, 1], [], []>} : vector<16x128xbf16>, vector<128x256xbf16>, vector<16x256xf32> -> vector<16x256xf32>
    %c0_3 = arith.constant 0 : index
    %c0_4 = arith.constant 0 : index
    %3 = vector.load %arg3[%c0_3, %c0_4] : memref<1x256xf32, #tpu.memory_space<vmem>>, vector<1x256xf32>
    %4 = vector.broadcast %3 : vector<1x256xf32> to vector<16x256xf32>
    %5 = arith.addf %2, %4 : vector<16x256xf32>
    %cst_5 = arith.constant 0.000000e+00 : f32
    %6 = vector.broadcast %cst_5 : f32 to vector<16x256xf32>
    %7 = arith.maximumf %5, %6 : vector<16x256xf32>
    %8 = arith.truncf %7 : vector<16x256xf32> to vector<16x256xbf16>
    %c0_6 = arith.constant 0 : index
    %c0_7 = arith.constant 0 : index
    %9 = vector.load %arg4[%c0_6, %c0_7] : memref<256x256xbf16, #tpu.memory_space<vmem>>, vector<256x256xbf16>
    %cst_8 = arith.constant dense<0.000000e+00> : vector<16x256xf32>
    %10 = tpu.matmul %8, %9, %cst_8 {dimension_numbers = #tpu.dot_dimension_numbers<[1], [0], [0], [1], [0, 0, 1, 1], [], []>} : vector<16x256xbf16>, vector<256x256xbf16>, vector<16x256xf32> -> vector<16x256xf32>
    %c0_9 = arith.constant 0 : index
    %c0_10 = arith.constant 0 : index
    %11 = vector.load %arg5[%c0_9, %c0_10] : memref<1x256xf32, #tpu.memory_space<vmem>>, vector<1x256xf32>
    %12 = vector.broadcast %11 : vector<1x256xf32> to vector<16x256xf32>
    %13 = arith.addf %10, %12 : vector<16x256xf32>
    %cst_11 = arith.constant 0.000000e+00 : f32
    %14 = vector.broadcast %cst_11 : f32 to vector<16x256xf32>
    %15 = arith.maximumf %13, %14 : vector<16x256xf32>
    %16 = arith.truncf %15 : vector<16x256xf32> to vector<16x256xbf16>
    %c0_12 = arith.constant 0 : index
    %c0_13 = arith.constant 0 : index
    %17 = vector.load %arg6[%c0_12, %c0_13] : memref<256x784xbf16, #tpu.memory_space<vmem>>, vector<256x784xbf16>
    %cst_14 = arith.constant dense<0.000000e+00> : vector<16x784xf32>
    %18 = tpu.matmul %16, %17, %cst_14 {dimension_numbers = #tpu.dot_dimension_numbers<[1], [0], [0], [1], [0, 0, 1, 1], [], []>} : vector<16x256xbf16>, vector<256x784xbf16>, vector<16x784xf32> -> vector<16x784xf32>
    %c0_15 = arith.constant 0 : index
    %c0_16 = arith.constant 0 : index
    %19 = vector.load %arg7[%c0_15, %c0_16] : memref<1x784xf32, #tpu.memory_space<vmem>>, vector<1x784xf32>
    %20 = vector.broadcast %19 : vector<1x784xf32> to vector<16x784xf32>
    %21 = arith.addf %18, %20 : vector<16x784xf32>
    %22 = math.tanh %21 : vector<16x784xf32>
    %c0_17 = arith.constant 0 : index
    %c0_18 = arith.constant 0 : index
    %23 = vector.load %arg8[%c0_17, %c0_18] : memref<16x784xf32, #tpu.memory_space<vmem>>, vector<16x784xf32>
    tpu.vector_store %arg8[%c0_17, %c0_18], %22 {strides = array<i32>} : memref<16x784xf32, #tpu.memory_space<vmem>>, vector<16x784xf32>,
    return
  }
  func.func @transform_0(%arg0: i32) -> (i32, i32) {
    %c0_i32 = arith.constant 0 : i32
    %c0_i32_0 = arith.constant 0 : i32
    return %arg0, %c0_i32 : i32, i32
  }
  func.func @transform_1(%arg0: i32) -> (i32, i32) {
    %c0_i32 = arith.constant 0 : i32
    %c0_i32_0 = arith.constant 0 : i32
    %c0_i32_1 = arith.constant 0 : i32
    return %c0_i32, %c0_i32_0 : i32, i32
  }
  func.func @transform_2(%arg0: i32) -> (i32, i32) {
    %c0_i32 = arith.constant 0 : i32
    %c0_i32_0 = arith.constant 0 : i32
    %c0_i32_1 = arith.constant 0 : i32
    return %c0_i32, %c0_i32_0 : i32, i32
  }
  func.func @transform_3(%arg0: i32) -> (i32, i32) {
    %c0_i32 = arith.constant 0 : i32
    %c0_i32_0 = arith.constant 0 : i32
    %c0_i32_1 = arith.constant 0 : i32
    return %c0_i32, %c0_i32_0 : i32, i32
  }
  func.func @transform_4(%arg0: i32) -> (i32, i32) {
    %c0_i32 = arith.constant 0 : i32
    %c0_i32_0 = arith.constant 0 : i32
    %c0_i32_1 = arith.constant 0 : i32
    return %c0_i32, %c0_i32_0 : i32, i32
  }
  func.func @transform_5(%arg0: i32) -> (i32, i32) {
    %c0_i32 = arith.constant 0 : i32
    %c0_i32_0 = arith.constant 0 : i32
    %c0_i32_1 = arith.constant 0 : i32
    return %c0_i32, %c0_i32_0 : i32, i32
  }
  func.func @transform_6(%arg0: i32) -> (i32, i32) {
    %c0_i32 = arith.constant 0 : i32
    %c0_i32_0 = arith.constant 0 : i32
    %c0_i32_1 = arith.constant 0 : i32
    return %c0_i32, %c0_i32_0 : i32, i32
  }
  func.func @transform_7(%arg0: i32) -> (i32, i32) {
    %c0_i32 = arith.constant 0 : i32
    %c0_i32_0 = arith.constant 0 : i32
    return %arg0, %c0_i32 : i32, i32
  }
}

</mosaic_0001>

<bundles_post_ra>
// kernel: tpu_custom_call.1
= control target key start
LH: loop header
LB: loop body
LE: loop exit
PB: predicated region body
PF: predicated region fallthrough
CT: control target
= control target key end

     0   :  { %12 = vsyncpa [#allocation3], 0  ;;  %v2110_v2 = vmov 0   ;;  %v54_v6 = vlaneseq  ;;  %v2111_v7 = vmov 1966171168   ;;  %vm1602_vm0 = vcmask 1041408   ;;  %s2755_s0 = inlined_call_operand.vmem [shape: bf16[2,128], index: 0, kind: input, shape index: {}]   ;;  %s2756_s1 = inlined_call_operand.vmem [shape: bf16[128,256], index: 1, kind: input, shape index: {}]   ;;  %s2757_s2 = inlined_call_operand.vmem [shape: f32[1,256], index: 2, kind: input, shape index: {}]   ;;  %s2758_s3 = inlined_call_operand.vmem [shape: bf16[256,256], index: 3, kind: input, shape index: {}]   ;;  %s2759_s4 = inlined_call_operand.vmem [shape: f32[1,256], index: 4, kind: input, shape index: {}]   ;;  %s2760_s5 = inlined_call_operand.vmem [shape: bf16[256,784], index: 5, kind: input, shape index: {}]   ;;  %s2761_s6 = inlined_call_operand.vmem [shape: f32[1,784], index: 6, kind: input, shape index: {}]   ;;  %s2762_s7 = inlined_call_operand.hbm [shape: f32[2,784], index: 7, kind: output, shape index: {}]  }
   0x1   :  { %v1826_v0 = vld [vmem:[%s2756_s1 + $0x4] ss:$8 sps:$4 sm:$0xff]   ;;  %v1828_v1 = vld [vmem:[%s2756_s1] ss:$8 sps:$4 sm:$0xff]   ;;  %234 = vmatprep.mubr.bf16.mxu0 %v2110_v2  ;;  %v1829_v3 = vld [vmem:[%s2756_s1 + $0x14] ss:$8 sps:$4 sm:$0xff]   ;;  %v77_v8 = vunpack.c.l.s4 %v2111_v7 }
   0x2   :  { %202 = vmatprep.subr.bf16.mxu0 %v1826_v0  ;;  %v1831_v4 = vld [vmem:[%s2756_s1 + $0x10] ss:$8 sps:$4 sm:$0xff]   ;;  %v1832_v5 = vld [vmem:[%s2756_s1 + $0x24] ss:$8 sps:$4 sm:$0xff]   ;;  %v1834_v9 = vld [vmem:[%s2756_s1 + $0x20] ss:$8 sps:$4 sm:$0xff]  }
   0x3   :  { %203 = vmatpush1.bf16.msra.mxu0 %v1828_v1  ;;  %v1835_v10 = vld [vmem:[%s2756_s1 + $0x34] ss:$8 sps:$4 sm:$0xff]   ;;  %v1837_v11 = vld [vmem:[%s2756_s1 + $0x30] ss:$8 sps:$4 sm:$0xff]   ;;  %v2180_v12 = vshrl.u32 %v54_v6, 7  ;;  %v78_v13 = vunpack.c.0.s8 %v77_v8  ;;  %vm1603_vm1 = vcmask 1043458  }
   0x4   :  { %204 = vmatprep.subr.bf16.mxu0 %v1829_v3  ;;  %v1838_v14 = vld [vmem:[%s2756_s1 + $0x44] ss:$8 sps:$4 sm:$0xff]   ;;  %v28_v15 = vld [vmem:[%s2755_s0] sm:$0x1]  ;;  %v29_v16 = vld [vmem:[%s2755_s0 + $0x1] sm:$0x1] }
   0x5   :  { %v30_v17 = vld [vmem:[%s2755_s0 + $0x2] sm:$0x1]  ;;  %v31_v18 = vld [vmem:[%s2755_s0 + $0x3] sm:$0x1]  ;;  %v32_v19 = vld [vmem:[%s2755_s0 + $0x4] sm:$0x1]  ;;  %v81_v23 = vsub.s32 %v78_v13, %v2180_v12  ;;  %v72_v26 = vcombine.low %v28_v15, %v29_v16 }
   0x6   :  { %v33_v20 = vld [vmem:[%s2755_s0 + $0x5] sm:$0x1]  ;;  %v34_v21 = vld [vmem:[%s2755_s0 + $0x6] sm:$0x1]  ;;  %v35_v22 = vld [vmem:[%s2755_s0 + $0x7] sm:$0x1]  ;;  %v73_v27 = vcombine.low %v30_v17, %v31_v18 }
   0x7   :  { %205 = vmatpush1.bf16.msra.mxu0 %v1831_v4  ;;  %v1850_v24 = vld [vmem:[%s2758_s3 + $0x4] ss:$8 sps:$4 sm:$0xff]   ;;  %v1852_v25 = vld [vmem:[%s2758_s3] ss:$8 sps:$4 sm:$0xff]   ;;  %v74_v28 = vcombine.low %v32_v19, %v33_v20  ;;  %v75_v29 = vcombine.low %v34_v21, %v35_v22  ;;  %v1853_v30 = vld [vmem:[%s2758_s3 + $0x14] ss:$8 sps:$4 sm:$0xff]   ;;  %v82_v35 = vrot.slane %v72_v26, %v81_v23 }
   0x8   :  { %206 = vmatprep.subr.bf16.mxu0 %v1832_v5  ;;  %v1840_v31 = vld [vmem:[%s2756_s1 + $0x40] ss:$8 sps:$4 sm:$0xff]   ;;  %455 = vmatprep.subr.bf16.mxu1 %v1850_v24  ;;  %v1841_v32 = vld [vmem:[%s2756_s1 + $0x54] ss:$8 sps:$4 sm:$0xff]   ;;  %v1855_v33 = vld [vmem:[%s2758_s3 + $0x10] ss:$8 sps:$4 sm:$0xff]   ;;  %v89_v36 = vrot.slane %v73_v27, %v81_v23 }
   0x9   :  { %456 = vmatpush1.bf16.msra.mxu1 %v1852_v25  ;;  %v1856_v34 = vld [vmem:[%s2758_s3 + $0x24] ss:$8 sps:$4 sm:$0xff]   ;;  %v96_v37 = vrot.slane %v74_v28, %v81_v23  ;;  %v103_v38 = vrot.slane %v75_v29, %v81_v23  ;;  %v1843_v39 = vld [vmem:[%s2756_s1 + $0x50] ss:$8 sps:$4 sm:$0xff]   ;;  %v1858_v41 = vld [vmem:[%s2758_s3 + $0x20] ss:$8 sps:$4 sm:$0xff]  }
   0xa   :  { %457 = vmatprep.subr.bf16.mxu1 %v1853_v30  ;;  %v1844_v40 = vld [vmem:[%s2756_s1 + $0x64] ss:$8 sps:$4 sm:$0xff]   ;;  %v1859_v42 = vld [vmem:[%s2758_s3 + $0x34] ss:$8 sps:$4 sm:$0xff]   ;;  %v104_v43 = vcombine.low %v82_v35, %v89_v36  ;;  %v1846_v45 = vld [vmem:[%s2756_s1 + $0x60] ss:$8 sps:$4 sm:$0xff]  }
   0xb   :  { %207 = vmatpush1.bf16.msra.mxu0 %v1834_v9  ;;  %v105_v44 = vcombine.low %v96_v37, %v103_v38  ;;  %v1847_v46 = vld [vmem:[%s2756_s1 + $0x74] ss:$8 sps:$4 sm:$0xff]   ;;  %v1861_v47 = vld [vmem:[%s2758_s3 + $0x30] ss:$8 sps:$4 sm:$0xff]   ;;  %v1862_v48 = vld [vmem:[%s2758_s3 + $0x44] ss:$8 sps:$4 sm:$0xff]  }
   0xc   :  { %208 = vmatprep.subr.bf16.mxu0 %v1835_v10  ;;  %v112_v49 = vrot.slane %v104_v43, %v81_v23  ;;  %v1849_v51 = vld [vmem:[%s2756_s1 + $0x70] ss:$8 sps:$4 sm:$0xff]   ;;  %v1864_v52 = vld [vmem:[%s2758_s3 + $0x40] ss:$8 sps:$4 sm:$0xff]   ;;  %v1865_v53 = vld [vmem:[%s2758_s3 + $0x54] ss:$8 sps:$4 sm:$0xff]  }
   0xd   :  { %458 = vmatpush1.bf16.msra.mxu1 %v1855_v33  ;;  %v119_v50 = vrot.slane %v105_v44, %v81_v23  ;;  %v1867_v55 = vld [vmem:[%s2758_s3 + $0x50] ss:$8 sps:$4 sm:$0xff]   ;;  %v1868_v56 = vld [vmem:[%s2758_s3 + $0x64] ss:$8 sps:$4 sm:$0xff]   ;;  %v1870_v57 = vld [vmem:[%s2758_s3 + $0x60] ss:$8 sps:$4 sm:$0xff]  }
   0xe   :  { %459 = vmatprep.subr.bf16.mxu1 %v1856_v34  ;;  %v1871_v58 = vld [vmem:[%s2758_s3 + $0x74] ss:$8 sps:$4 sm:$0xff]   ;;  %v1873_v59 = vld [vmem:[%s2758_s3 + $0x70] ss:$8 sps:$4 sm:$0xff]   ;;  %v1874_v60 = vld [vmem:[%s2758_s3 + $0x84] ss:$8 sps:$4 sm:$0xff]  }
   0xf   :  { %209 = vmatpush1.bf16.msra.mxu0 %v1837_v11  ;;  %v120_v54 = vcombine.low %v112_v49, %v119_v50  ;;  %v1876_v61 = vld [vmem:[%s2758_s3 + $0x80] ss:$8 sps:$4 sm:$0xff]   ;;  %v1877_v62 = vld [vmem:[%s2758_s3 + $0x94] ss:$8 sps:$4 sm:$0xff]   ;;  %v1879_v63 = vld [vmem:[%s2758_s3 + $0x90] ss:$8 sps:$4 sm:$0xff]  }
  0x10   :  { %210 = vmatprep.subr.bf16.mxu0 %v1838_v14  ;;  %v1880_v0 = vld [vmem:[%s2758_s3 + $0xa4] ss:$8 sps:$4 sm:$0xff]   ;;  %v1882_v1 = vld [vmem:[%s2758_s3 + $0xa0] ss:$8 sps:$4 sm:$0xff]   ;;  %v1883_v2 = vld [vmem:[%s2758_s3 + $0xb4] ss:$8 sps:$4 sm:$0xff]  }
  0x11   :  { %460 = vmatpush1.bf16.msra.mxu1 %v1858_v41  ;;  %v1885_v3 = vld [vmem:[%s2758_s3 + $0xb0] ss:$8 sps:$4 sm:$0xff]   ;;  %v1886_v4 = vld [vmem:[%s2758_s3 + $0xc4] ss:$8 sps:$4 sm:$0xff]   ;;  %v1888_v5 = vld [vmem:[%s2758_s3 + $0xc0] ss:$8 sps:$4 sm:$0xff]  }
  0x12   :  { %461 = vmatprep.subr.bf16.mxu1 %v1859_v42  ;;  %v1889_v6 = vld [vmem:[%s2758_s3 + $0xd4] ss:$8 sps:$4 sm:$0xff]   ;;  %v1891_v7 = vld [vmem:[%s2758_s3 + $0xd0] ss:$8 sps:$4 sm:$0xff]   ;;  %v1892_v8 = vld [vmem:[%s2758_s3 + $0xe4] ss:$8 sps:$4 sm:$0xff]  }
  0x13   :  { %211 = vmatpush1.bf16.msra.mxu0 %v1840_v31  ;;  %v1894_v9 = vld [vmem:[%s2758_s3 + $0xe0] ss:$8 sps:$4 sm:$0xff]   ;;  %v1895_v10 = vld [vmem:[%s2758_s3 + $0xf4] ss:$8 sps:$4 sm:$0xff]   ;;  %v1897_v11 = vld [vmem:[%s2758_s3 + $0xf0] ss:$8 sps:$4 sm:$0xff]  }
  0x14   :  { %212 = vmatprep.subr.bf16.mxu0 %v1841_v32  ;;  %v1898_v13 = vld [vmem:[%s2760_s5] ss:$28 sps:$4 sm:$0xff]   ;;  %v1903_v15 = vld [vmem:[%s2760_s5 + $0xc] ss:$28 sps:$4 sm:$0xff]   ;;  %v1904_v17 = vld [vmem:[%s2760_s5 + $0x38] ss:$28 sps:$4 sm:$0xff]  }
  0x15   :  { %462 = vmatpush1.bf16.msra.mxu1 %v1861_v47  ;;  %v1900_v14 = vld [vmem:[%s2760_s5 + $0x4] ss:$28 sps:$4 sm:$0xff]   ;;  %v1906_v16 = vld [vmem:[%s2760_s5 + $0x3c] ss:$28 sps:$4 sm:$0xff]   ;;  %v1912_v18 = vld [vmem:[%s2760_s5 + $0x74] ss:$28 sps:$4 sm:$0xff]  }
  0x16   :  { %463 = vmatprep.subr.bf16.mxu1 %v1862_v48  ;;  %v1910_v19 = vld [vmem:[%s2760_s5 + $0x70] ss:$28 sps:$4 sm:$0xff]   ;;  %v1916_v21 = vld [vmem:[%s2760_s5 + $0xa8] ss:$28 sps:$4 sm:$0xff]   ;;  %v1922_v23 = vld [vmem:[%s2760_s5 + $0xe0] ss:$28 sps:$4 sm:$0xff]  }
  0x17   :  { %213 = vmatpush1.bf16.msra.mxu0 %v1843_v39  ;;  %v1918_v20 = vld [vmem:[%s2760_s5 + $0xac] ss:$28 sps:$4 sm:$0xff]   ;;  %v1924_v22 = vld [vmem:[%s2760_s5 + $0xe4] ss:$28 sps:$4 sm:$0xff]   ;;  %v1930_v24 = vld [vmem:[%s2760_s5 + $0x11c] ss:$28 sps:$4 sm:$0xff]  }
  0x18   :  { %214 = vmatprep.subr.bf16.mxu0 %v1844_v40  ;;  %v1928_v25 = vld [vmem:[%s2760_s5 + $0x118] ss:$28 sps:$4 sm:$0xff]   ;;  %v1934_v27 = vld [vmem:[%s2760_s5 + $0x150] ss:$28 sps:$4 sm:$0xff]   ;;  %v1940_v29 = vld [vmem:[%s2760_s5 + $0x188] ss:$28 sps:$4 sm:$0xff]  }
  0x19   :  { %464 = vmatpush1.bf16.msra.mxu1 %v1864_v52  ;;  %v1936_v26 = vld [vmem:[%s2760_s5 + $0x154] ss:$28 sps:$4 sm:$0xff]   ;;  %v1942_v28 = vld [vmem:[%s2760_s5 + $0x18c] ss:$28 sps:$4 sm:$0xff]   ;;  %v1948_v30 = vld [vmem:[%s2760_s5 + $0x1c4] ss:$28 sps:$4 sm:$0xff]  }
  0x1a   :  { %465 = vmatprep.subr.bf16.mxu1 %v1865_v53  ;;  %v1946_v31 = vld [vmem:[%s2760_s5 + $0x1c0] ss:$28 sps:$4 sm:$0xff]   ;;  %v1952_v33 = vld [vmem:[%s2760_s5 + $0x1f8] ss:$28 sps:$4 sm:$0xff]   ;;  %v1958_v35 = vld [vmem:[%s2760_s5 + $0x230] ss:$28 sps:$4 sm:$0xff]  }
  0x1b   :  { %215 = vmatpush1.bf16.msra.mxu0 %v1846_v45  ;;  %v1954_v32 = vld [vmem:[%s2760_s5 + $0x1fc] ss:$28 sps:$4 sm:$0xff]   ;;  %v1960_v34 = vld [vmem:[%s2760_s5 + $0x234] ss:$28 sps:$4 sm:$0xff]   ;;  %v1966_v36 = vld [vmem:[%s2760_s5 + $0x26c] ss:$28 sps:$4 sm:$0xff]  }
  0x1c   :  { %216 = vmatprep.subr.bf16.mxu0 %v1847_v46  ;;  %v1964_v37 = vld [vmem:[%s2760_s5 + $0x268] ss:$28 sps:$4 sm:$0xff]   ;;  %v1970_v39 = vld [vmem:[%s2760_s5 + $0x2a0] ss:$28 sps:$4 sm:$0xff]   ;;  %v1976_v41 = vld [vmem:[%s2760_s5 + $0x2d8] ss:$28 sps:$4 sm:$0xff]  }
  0x1d   :  { %466 = vmatpush1.bf16.msra.mxu1 %v1867_v55  ;;  %v1972_v38 = vld [vmem:[%s2760_s5 + $0x2a4] ss:$28 sps:$4 sm:$0xff]   ;;  %v1978_v40 = vld [vmem:[%s2760_s5 + $0x2dc] ss:$28 sps:$4 sm:$0xff]   ;;  %v2415_v42 = vsub.s32 0, %v2180_v12  ;;  %v2421_v44 = vsub.s32 1, %v2180_v12  ;;  %vm1604_vm2 = vmor %vm1603_vm1, %vm1602_vm0 }
  0x1e   :  { %467 = vmatprep.subr.bf16.mxu1 %v1868_v56  ;;  %v52_v43 = vld [vmem:[%s2757_s2] sm:$0x3]  ;;  %vm1605_vm3 = vcmask 128004  }
  0x1f   :  { %217 = vmatpush1.bf16.msra.mxu0 %v1849_v51  ;;  %v57_v45 = vrot.slane %v52_v43, %v2415_v42  ;;  %v61_v46 = vrot.slane %v52_v43, %v2421_v44  ;;  %vm2719_vm4 = vmor %vm1605_vm3, %vm1604_vm2 }
  0x20   :  { %1245 = vmatprep.subr.bf16.mxu0 %v1900_v14  ;;  %v1949_v14 = vld [vmem:[%s2760_s5 + $0x1c8] ss:$28 sps:$4 sm:$0xff]  }
  0x21   :  { %468 = vmatpush1.bf16.msra.mxu1 %v1870_v57 }
  0x22   :  { %235 = vmatmul.mubr.bf16.vlgmr.msra.gmra.mrb[0].mxu0 %v120_v54  ;;  %469 = vmatprep.subr.bf16.mxu1 %v1871_v58 }
  0x23   :  { %1246 = vmatpush1.bf16.msra.mxu0 %v1898_v13  ;;  %v1951_v13 = vld [vmem:[%s2760_s5 + $0x1cc] ss:$28 sps:$4 sm:$0xff]  }
  0x24   :  { %1247 = vmatprep.subr.bf16.mxu0 %v1906_v16  ;;  %v1955_v16 = vld [vmem:[%s2760_s5 + $0x200] ss:$28 sps:$4 sm:$0xff]  }
  0x25   :  { %470 = vmatpush1.bf16.msra.mxu1 %v1873_v59 }
  0x26   :  { %471 = vmatprep.subr.bf16.mxu1 %v1874_v60 }
  0x27   :  { %1248 = vmatpush1.bf16.msra.mxu0 %v1904_v17  ;;  %v1963_v17 = vld [vmem:[%s2760_s5 + $0x23c] ss:$28 sps:$4 sm:$0xff]  }
  0x28   :  { %1249 = vmatprep.subr.bf16.mxu0 %v1912_v18  ;;  %v1961_v18 = vld [vmem:[%s2760_s5 + $0x238] ss:$28 sps:$4 sm:$0xff]  }
  0x29   :  { %472 = vmatpush1.bf16.msra.mxu1 %v1876_v61  ;;  %v1901_v61 = vld [vmem:[%s2760_s5 + $0x8] ss:$28 sps:$4 sm:$0xff]  }
  0x2a   :  { %473 = vmatprep.subr.bf16.mxu1 %v1877_v62  ;;  %v1909_v62 = vld [vmem:[%s2760_s5 + $0x44] ss:$28 sps:$4 sm:$0xff]  }
  0x2b   :  { %1250 = vmatpush1.bf16.msra.mxu0 %v1910_v19  ;;  %v1969_v19 = vld [vmem:[%s2760_s5 + $0x274] ss:$28 sps:$4 sm:$0xff]  }
  0x2c   :  { %1251 = vmatprep.subr.bf16.mxu0 %v1918_v20  ;;  %v1967_v20 = vld [vmem:[%s2760_s5 + $0x270] ss:$28 sps:$4 sm:$0xff]  }
  0x2d   :  { %474 = vmatpush1.bf16.msra.mxu1 %v1879_v63  ;;  %v1907_v63 = vld [vmem:[%s2760_s5 + $0x40] ss:$28 sps:$4 sm:$0xff]  }
  0x2e   :  { %475 = vmatprep.subr.bf16.mxu1 %v1880_v0  ;;  %v1915_v0 = vld [vmem:[%s2760_s5 + $0x7c] ss:$28 sps:$4 sm:$0xff]  }
  0x2f   :  { %1252 = vmatpush1.bf16.msra.mxu0 %v1916_v21  ;;  %v1975_v21 = vld [vmem:[%s2760_s5 + $0x2ac] ss:$28 sps:$4 sm:$0xff]  }
  0x30   :  { %1253 = vmatprep.subr.bf16.mxu0 %v1924_v22  ;;  %v1973_v22 = vld [vmem:[%s2760_s5 + $0x2a8] ss:$28 sps:$4 sm:$0xff]  }
  0x31   :  { %476 = vmatpush1.bf16.msra.mxu1 %v1882_v1  ;;  %v1913_v1 = vld [vmem:[%s2760_s5 + $0x78] ss:$28 sps:$4 sm:$0xff]  }
  0x32   :  { %477 = vmatprep.subr.bf16.mxu1 %v1883_v2  ;;  %v1921_v2 = vld [vmem:[%s2760_s5 + $0xb4] ss:$28 sps:$4 sm:$0xff]  }
  0x33   :  { %1254 = vmatpush1.bf16.msra.mxu0 %v1922_v23  ;;  %v1981_v23 = vld [vmem:[%s2760_s5 + $0x2e4] ss:$28 sps:$4 sm:$0xff]  }
  0x34   :  { %1255 = vmatprep.subr.bf16.mxu0 %v1930_v24  ;;  %v1979_v24 = vld [vmem:[%s2760_s5 + $0x2e0] ss:$28 sps:$4 sm:$0xff]  }
  0x35   :  { %478 = vmatpush1.bf16.msra.mxu1 %v1885_v3  ;;  %v1919_v3 = vld [vmem:[%s2760_s5 + $0xb0] ss:$28 sps:$4 sm:$0xff]  }
  0x36   :  { %479 = vmatprep.subr.bf16.mxu1 %v1886_v4  ;;  %v1927_v4 = vld [vmem:[%s2760_s5 + $0xec] ss:$28 sps:$4 sm:$0xff]  }
  0x37   :  { %1256 = vmatpush1.bf16.msra.mxu0 %v1928_v25  ;;  %v1984_v25 = vld [vmem:[%s2760_s5 + $0x314] ss:$28 sps:$4 sm:$0xff]  }
  0x38   :  { %1257 = vmatprep.subr.bf16.mxu0 %v1936_v26  ;;  %v1987_v26 = vld [vmem:[%s2760_s5 + $0x31c] ss:$28 sps:$4 sm:$0xff]  }
  0x39   :  { %480 = vmatpush1.bf16.msra.mxu1 %v1888_v5  ;;  %v1925_v5 = vld [vmem:[%s2760_s5 + $0xe8] ss:$28 sps:$4 sm:$0xff]  }
  0x3a   :  { %481 = vmatprep.subr.bf16.mxu1 %v1889_v6  ;;  %v1933_v6 = vld [vmem:[%s2760_s5 + $0x124] ss:$28 sps:$4 sm:$0xff]  }
  0x3b   :  { %1258 = vmatpush1.bf16.msra.mxu0 %v1934_v27  ;;  %v1982_v27 = vld [vmem:[%s2760_s5 + $0x310] ss:$28 sps:$4 sm:$0xff]  }
  0x3c   :  { %1259 = vmatprep.subr.bf16.mxu0 %v1942_v28  ;;  %v1985_v28 = vld [vmem:[%s2760_s5 + $0x318] ss:$28 sps:$4 sm:$0xff]  }
  0x3d   :  { %482 = vmatpush1.bf16.msra.mxu1 %v1891_v7  ;;  %v1931_v7 = vld [vmem:[%s2760_s5 + $0x120] ss:$28 sps:$4 sm:$0xff]  }
  0x3e   :  { %483 = vmatprep.subr.bf16.mxu1 %v1892_v8  ;;  %v1939_v8 = vld [vmem:[%s2760_s5 + $0x15c] ss:$28 sps:$4 sm:$0xff]  }
  0x3f   :  { %1260 = vmatpush1.bf16.msra.mxu0 %v1940_v29  ;;  %v1990_v29 = vld [vmem:[%s2760_s5 + $0x34c] ss:$28 sps:$4 sm:$0xff]  }
  0x40   :  { %1261 = vmatprep.subr.bf16.mxu0 %v1948_v30  ;;  %v1993_v30 = vld [vmem:[%s2760_s5 + $0x354] ss:$28 sps:$4 sm:$0xff]  }
  0x41   :  { %484 = vmatpush1.bf16.msra.mxu1 %v1894_v9  ;;  %v1937_v9 = vld [vmem:[%s2760_s5 + $0x158] ss:$28 sps:$4 sm:$0xff]  }
  0x42   :  { %485 = vmatprep.subr.bf16.mxu1 %v1895_v10  ;;  %v1945_v10 = vld [vmem:[%s2760_s5 + $0x194] ss:$28 sps:$4 sm:$0xff]  }
  0x43   :  { %1262 = vmatpush1.bf16.msra.mxu0 %v1946_v31  ;;  %v1988_v31 = vld [vmem:[%s2760_s5 + $0x348] ss:$28 sps:$4 sm:$0xff]  }
  0x44   :  { %1263 = vmatprep.subr.bf16.mxu0 %v1954_v32  ;;  %v1991_v32 = vld [vmem:[%s2760_s5 + $0x350] ss:$28 sps:$4 sm:$0xff]  }
  0x45   :  { %486 = vmatpush1.bf16.msra.mxu1 %v1897_v11  ;;  %v1943_v11 = vld [vmem:[%s2760_s5 + $0x190] ss:$28 sps:$4 sm:$0xff]  }
  0x46   :  { %1288 = vmatprep.subr.bf16.mxu1 %v1903_v15  ;;  %v1957_v15 = vld [vmem:[%s2760_s5 + $0x204] ss:$28 sps:$4 sm:$0xff]  }
  0x47   :  { %1264 = vmatpush1.bf16.msra.mxu0 %v1952_v33  ;;  %v1996_v33 = vld [vmem:[%s2760_s5 + $0x14] ss:$28 sps:$4 sm:$0xff]  }
  0x48   :  { %1265 = vmatprep.subr.bf16.mxu0 %v1960_v34  ;;  %v1997_v34 = vld [vmem:[%s2760_s5 + $0x1d8] ss:$28 sps:$4 sm:$0xff]  }
  0x4b   :  { %1266 = vmatpush1.bf16.msra.mxu0 %v1958_v35  ;;  %v283_v35 = vld [vmem:[%s2759_s4] sm:$0x3] }
  0x4c   :  { %1267 = vmatprep.subr.bf16.mxu0 %v1966_v36  ;;  %v288_v36 = vrot.slane %v283_v35, %v2415_v42 }
  0x4f   :  { %1268 = vmatpush1.bf16.msra.mxu0 %v1964_v37  ;;  %v292_v37 = vrot.slane %v283_v35, %v2421_v44  ;;  %v2057_v35 = vld [vmem:[%s2760_s5 + $0x35c] ss:$28 sps:$4 sm:$0xff]  }
  0x50   :  { %1269 = vmatprep.subr.bf16.mxu0 %v1972_v38 }
  0x53   :  { %1270 = vmatpush1.bf16.msra.mxu0 %v1970_v39 }
  0x54   :  { %1271 = vmatprep.subr.bf16.mxu0 %v1978_v40 }
  0x57   :  { %1272 = vmatpush1.bf16.msra.mxu0 %v1976_v41 }
  0x58   :  { %1273 = vmatprep.subr.bf16.mxu0 %v1984_v25  ;;  %v2042_v25 = vld [vmem:[%s2760_s5 + $0x244] ss:$28 sps:$4 sm:$0xff]  }
  0x5b   :  { %1274 = vmatpush1.bf16.msra.mxu0 %v1982_v27  ;;  %v2045_v27 = vld [vmem:[%s2760_s5 + $0x27c] ss:$28 sps:$4 sm:$0xff]  }
  0x5c   :  { %1275 = vmatprep.subr.bf16.mxu0 %v1990_v29  ;;  %v2048_v29 = vld [vmem:[%s2760_s5 + $0x2b4] ss:$28 sps:$4 sm:$0xff]  }
  0x5f   :  { %1276 = vmatpush1.bf16.msra.mxu0 %v1988_v31  ;;  %v2051_v31 = vld [vmem:[%s2760_s5 + $0x2ec] ss:$28 sps:$4 sm:$0xff]  }
  0x60   :  { %1331 = vmatprep.subr.bf16.mxu0 %v1996_v33  ;;  %v2054_v33 = vld [vmem:[%s2760_s5 + $0x324] ss:$28 sps:$4 sm:$0xff]  }
  0xf5   :  { %v236_v47 = vpop.f32.mrb[0].mxu0 }
  0xf6   :  { %v237_v48 = vadd.f32 %v236_v47, %v57_v45  ;;  %v238_v49 = vpop.f32.mrb[1].mxu0 }
  0xf7   :  { %v239_v50 = vadd.f32 %v238_v49, %v61_v46  ;;  %v240_v51 = vpop.f32.mrb[2].mxu0 }
  0xf8   :  { %v241_v52 = vadd.f32 %v240_v51, %v57_v45  ;;  %v242_v53 = vpop.f32.mrb[3].mxu0  ;;  %v245_v55 = vmax.f32 %v237_v48, 0.0 }
  0xf9   :  { %v243_v54 = vadd.f32 %v242_v53, %v61_v46  ;;  %v246_v57 = vmax.f32 %v239_v50, 0.0 }
  0xfa   :  { %v247_v56 = vmax.f32 %v241_v52, 0.0 }
  0xfb   :  { %v248_v58 = vmax.f32 %v243_v54, 0.0  ;;  %v1994_v54 = vld [vmem:[%s2760_s5 + $0x10] ss:$28 sps:$4 sm:$0xff]  }
  0xfc   :  { %v249_v59 = vpack.c.bf16 %v247_v56, %v245_v55  ;;  %v1998_v55 = vld [vmem:[%s2760_s5 + $0x18] ss:$28 sps:$4 sm:$0xff]   ;;  %v2001_v56 = vld [vmem:[%s2760_s5 + $0x4c] ss:$28 sps:$4 sm:$0xff]  }
  0xfd   :  { %v250_v60 = vpack.c.bf16 %v248_v58, %v246_v57  ;;  %v2002_v57 = vld [vmem:[%s2760_s5 + $0x210] ss:$28 sps:$4 sm:$0xff]   ;;  %v1999_v58 = vld [vmem:[%s2760_s5 + $0x48] ss:$28 sps:$4 sm:$0xff]  }
  0xff   :  { %487 = vmatprep.mubr.bf16.mxu1 %v250_v60  ;;  %v2006_v60 = vld [vmem:[%s2760_s5 + $0x84] ss:$28 sps:$4 sm:$0xff]  }
 0x100   :  { %488 = vmatmul.mubr.bf16.vlgmr.msra.gmra.mrb[0].mxu1 %v249_v59  ;;  %v2003_v59 = vld [vmem:[%s2760_s5 + $0x50] ss:$28 sps:$4 sm:$0xff]  }
 0x101   :  { %1289 = vmatpush1.bf16.msra.mxu1 %v1901_v61  ;;  %v2007_v61 = vld [vmem:[%s2760_s5 + $0x248] ss:$28 sps:$4 sm:$0xff]  }
 0x102   :  { %1290 = vmatprep.subr.bf16.mxu1 %v1909_v62  ;;  %v2004_v62 = vld [vmem:[%s2760_s5 + $0x80] ss:$28 sps:$4 sm:$0xff]  }
 0x105   :  { %1291 = vmatpush1.bf16.msra.mxu1 %v1907_v63  ;;  %v2008_v63 = vld [vmem:[%s2760_s5 + $0x88] ss:$28 sps:$4 sm:$0xff]  }
 0x106   :  { %1292 = vmatprep.subr.bf16.mxu1 %v1915_v0  ;;  %v2011_v0 = vld [vmem:[%s2760_s5 + $0xbc] ss:$28 sps:$4 sm:$0xff]  }
 0x109   :  { %1293 = vmatpush1.bf16.msra.mxu1 %v1913_v1  ;;  %v2012_v1 = vld [vmem:[%s2760_s5 + $0x280] ss:$28 sps:$4 sm:$0xff]  }
 0x10a   :  { %1294 = vmatprep.subr.bf16.mxu1 %v1921_v2  ;;  %v2009_v2 = vld [vmem:[%s2760_s5 + $0xb8] ss:$28 sps:$4 sm:$0xff]  }
 0x10d   :  { %1295 = vmatpush1.bf16.msra.mxu1 %v1919_v3  ;;  %v2013_v3 = vld [vmem:[%s2760_s5 + $0xc0] ss:$28 sps:$4 sm:$0xff]  }
 0x10e   :  { %1296 = vmatprep.subr.bf16.mxu1 %v1927_v4  ;;  %v2016_v4 = vld [vmem:[%s2760_s5 + $0xf4] ss:$28 sps:$4 sm:$0xff]  }
 0x111   :  { %1297 = vmatpush1.bf16.msra.mxu1 %v1925_v5  ;;  %v2017_v5 = vld [vmem:[%s2760_s5 + $0x2b8] ss:$28 sps:$4 sm:$0xff]  }
 0x112   :  { %1298 = vmatprep.subr.bf16.mxu1 %v1933_v6  ;;  %v2014_v6 = vld [vmem:[%s2760_s5 + $0xf0] ss:$28 sps:$4 sm:$0xff]  }
 0x115   :  { %1299 = vmatpush1.bf16.msra.mxu1 %v1931_v7  ;;  %v2018_v7 = vld [vmem:[%s2760_s5 + $0xf8] ss:$28 sps:$4 sm:$0xff]  }
 0x116   :  { %1300 = vmatprep.subr.bf16.mxu1 %v1939_v8  ;;  %v2021_v8 = vld [vmem:[%s2760_s5 + $0x12c] ss:$28 sps:$4 sm:$0xff]  }
 0x119   :  { %1301 = vmatpush1.bf16.msra.mxu1 %v1937_v9  ;;  %v2022_v9 = vld [vmem:[%s2760_s5 + $0x2f0] ss:$28 sps:$4 sm:$0xff]  }
 0x11a   :  { %1302 = vmatprep.subr.bf16.mxu1 %v1945_v10  ;;  %v2019_v10 = vld [vmem:[%s2760_s5 + $0x128] ss:$28 sps:$4 sm:$0xff]  }
 0x11d   :  { %1303 = vmatpush1.bf16.msra.mxu1 %v1943_v11  ;;  %v2023_v11 = vld [vmem:[%s2760_s5 + $0x130] ss:$28 sps:$4 sm:$0xff]  }
 0x11e   :  { %1304 = vmatprep.subr.bf16.mxu1 %v1951_v13  ;;  %v2026_v13 = vld [vmem:[%s2760_s5 + $0x164] ss:$28 sps:$4 sm:$0xff]  }
 0x121   :  { %1305 = vmatpush1.bf16.msra.mxu1 %v1949_v14  ;;  %v2027_v14 = vld [vmem:[%s2760_s5 + $0x328] ss:$28 sps:$4 sm:$0xff]  }
 0x122   :  { %1306 = vmatprep.subr.bf16.mxu1 %v1957_v15  ;;  %v2024_v15 = vld [vmem:[%s2760_s5 + $0x160] ss:$28 sps:$4 sm:$0xff]  }
 0x125   :  { %1307 = vmatpush1.bf16.msra.mxu1 %v1955_v16  ;;  %v2028_v16 = vld [vmem:[%s2760_s5 + $0x168] ss:$28 sps:$4 sm:$0xff]  }
 0x126   :  { %1308 = vmatprep.subr.bf16.mxu1 %v1963_v17  ;;  %v2031_v17 = vld [vmem:[%s2760_s5 + $0x19c] ss:$28 sps:$4 sm:$0xff]  }
 0x129   :  { %1309 = vmatpush1.bf16.msra.mxu1 %v1961_v18  ;;  %v2032_v18 = vld [vmem:[%s2760_s5 + $0x360] ss:$28 sps:$4 sm:$0xff]  }
 0x12a   :  { %1310 = vmatprep.subr.bf16.mxu1 %v1969_v19  ;;  %v2029_v19 = vld [vmem:[%s2760_s5 + $0x198] ss:$28 sps:$4 sm:$0xff]  }
 0x12d   :  { %1311 = vmatpush1.bf16.msra.mxu1 %v1967_v20  ;;  %v2033_v20 = vld [vmem:[%s2760_s5 + $0x1a0] ss:$28 sps:$4 sm:$0xff]  }
 0x12e   :  { %1312 = vmatprep.subr.bf16.mxu1 %v1975_v21  ;;  %v2036_v21 = vld [vmem:[%s2760_s5 + $0x1d4] ss:$28 sps:$4 sm:$0xff]  }
 0x131   :  { %1313 = vmatpush1.bf16.msra.mxu1 %v1973_v22  ;;  %v2034_v22 = vld [vmem:[%s2760_s5 + $0x1d0] ss:$28 sps:$4 sm:$0xff]  }
 0x132   :  { %1314 = vmatprep.subr.bf16.mxu1 %v1981_v23  ;;  %v2039_v23 = vld [vmem:[%s2760_s5 + $0x20c] ss:$28 sps:$4 sm:$0xff]  }
 0x135   :  { %1315 = vmatpush1.bf16.msra.mxu1 %v1979_v24  ;;  %v2037_v24 = vld [vmem:[%s2760_s5 + $0x208] ss:$28 sps:$4 sm:$0xff]  }
 0x136   :  { %1316 = vmatprep.subr.bf16.mxu1 %v1987_v26  ;;  %v2040_v26 = vld [vmem:[%s2760_s5 + $0x240] ss:$28 sps:$4 sm:$0xff]  }
 0x139   :  { %1317 = vmatpush1.bf16.msra.mxu1 %v1985_v28  ;;  %v2043_v28 = vld [vmem:[%s2760_s5 + $0x278] ss:$28 sps:$4 sm:$0xff]  }
 0x13a   :  { %1318 = vmatprep.subr.bf16.mxu1 %v1993_v30  ;;  %v2046_v30 = vld [vmem:[%s2760_s5 + $0x2b0] ss:$28 sps:$4 sm:$0xff]  }
 0x13d   :  { %1319 = vmatpush1.bf16.msra.mxu1 %v1991_v32  ;;  %v2049_v32 = vld [vmem:[%s2760_s5 + $0x2e8] ss:$28 sps:$4 sm:$0xff]  }
 0x13e   :  { %1798 = vmatprep.subr.bf16.mxu1 %v1997_v34  ;;  %v2052_v34 = vld [vmem:[%s2760_s5 + $0x320] ss:$28 sps:$4 sm:$0xff]  }
 0x1d3   :  { %v489_v38 = vpop.f32.mrb[0].mxu1 }
 0x1d4   :  { %v490_v39 = vadd.f32 %v489_v38, %v288_v36  ;;  %v491_v40 = vpop.f32.mrb[1].mxu1  ;;  %v2689_v38 = vld [vmem:[%s2761_s6] sm:$0x7f] }
 0x1d5   :  { %v492_v41 = vadd.f32 %v491_v40, %v292_v37  ;;  %v493_v43 = vpop.f32.mrb[2].mxu1  ;;  %v637_v40 = vrot.slane %v2689_v38, %v2415_v42 }
 0x1d6   :  { %v494_v45 = vadd.f32 %v493_v43, %v288_v36  ;;  %v495_v46 = vpop.f32.mrb[3].mxu1  ;;  %v498_v48 = vmax.f32 %v490_v39, 0.0  ;;  %v2055_v36 = vld [vmem:[%s2760_s5 + $0x358] ss:$28 sps:$4 sm:$0xff]   ;;  %v648_v39 = vsub.s32 3, %v2180_v12  ;;  %v641_v43 = vrot.slane %v2689_v38, %v2421_v44 }
 0x1d7   :  { %v496_v47 = vadd.f32 %v495_v46, %v292_v37  ;;  %v499_v50 = vmax.f32 %v492_v41, 0.0  ;;  %v644_v37 = vsub.s32 2, %v2180_v12 }
 0x1d8   :  { %v500_v49 = vmax.f32 %v494_v45, 0.0  ;;  %v649_v45 = vrot.slane %v2689_v38, %v648_v39 }
 0x1d9   :  { %v501_v51 = vmax.f32 %v496_v47, 0.0  ;;  %v645_v41 = vrot.slane %v2689_v38, %v644_v37 }
 0x1da   :  { %v2541_v52 = vpack.c.bf16 %v500_v49, %v498_v48 }
 0x1db   :  { %v503_v53 = vpack.c.bf16 %v501_v51, %v499_v50 }
 0x1dd   :  { %1277 = vmatprep.mubr.bf16.mxu0 %v503_v53  ;;  %1320 = vmatprep.mubr.bf16.mxu1 %v503_v53 }
 0x1de   :  { %1278 = vmatmul.mubr.bf16.vlgmr.msra.gmra.mrb[4].mxu0 %v2541_v52  ;;  %1321 = vmatmul.mubr.bf16.vlgmr.msra.gmra.mrb[4].mxu1 %v2541_v52 }
 0x1df   :  { %1332 = vmatpush1.bf16.msra.mxu0 %v1994_v54  ;;  %1799 = vmatpush3.bf16.msra.mxu1 %v1998_v55 }
 0x1e0   :  { %1363 = vmatprep.mubr.bf16.mxu0 %v503_v53  ;;  %1406 = vmatprep.mubr.bf16.mxu1 %v503_v53 }
 0x1e1   :  { %1333 = vmatprep.subr.bf16.mxu0 %v2001_v56  ;;  %1800 = vmatprep.subr.bf16.mxu1 %v2002_v57 }
 0x1e3   :  { %1334 = vmatpush1.bf16.msra.mxu0 %v1999_v58  ;;  %1801 = vmatpush3.bf16.msra.mxu1 %v2003_v59  ;;  %v2112_v59 = vmov 1983009808  }
 0x1e4   :  { %1335 = vmatprep.subr.bf16.mxu0 %v2006_v60  ;;  %1802 = vmatprep.subr.bf16.mxu1 %v2007_v61  ;;  %v1448_v60 = vunpack.c.l.s4 %v2112_v59 }
 0x1e7   :  { %1336 = vmatpush1.bf16.msra.mxu0 %v2004_v62  ;;  %1803 = vmatpush3.bf16.msra.mxu1 %v2008_v63  ;;  %v1449_v62 = vunpack.c.0.s8 %v1448_v60 }
 0x1e8   :  { %1337 = vmatprep.subr.bf16.mxu0 %v2011_v0  ;;  %1804 = vmatprep.subr.bf16.mxu1 %v2012_v1 }
 0x1e9   :  { %v2699_v1 = vsub.s32 %v1449_v62, %v2180_v12 }
 0x1eb   :  { %1338 = vmatpush1.bf16.msra.mxu0 %v2009_v2  ;;  %1805 = vmatpush3.bf16.msra.mxu1 %v2013_v3 }
 0x1ec   :  { %1339 = vmatprep.subr.bf16.mxu0 %v2016_v4  ;;  %1806 = vmatprep.subr.bf16.mxu1 %v2017_v5 }
 0x1ef   :  { %1340 = vmatpush1.bf16.msra.mxu0 %v2014_v6  ;;  %1807 = vmatpush3.bf16.msra.mxu1 %v2018_v7 }
 0x1f0   :  { %1341 = vmatprep.subr.bf16.mxu0 %v2021_v8  ;;  %1808 = vmatprep.subr.bf16.mxu1 %v2022_v9 }
 0x1f3   :  { %1342 = vmatpush1.bf16.msra.mxu0 %v2019_v10  ;;  %1809 = vmatpush3.bf16.msra.mxu1 %v2023_v11 }
 0x1f4   :  { %1343 = vmatprep.subr.bf16.mxu0 %v2026_v13  ;;  %1810 = vmatprep.subr.bf16.mxu1 %v2027_v14 }
 0x1f7   :  { %1344 = vmatpush1.bf16.msra.mxu0 %v2024_v15  ;;  %1811 = vmatpush3.bf16.msra.mxu1 %v2028_v16 }
 0x1f8   :  { %1345 = vmatprep.subr.bf16.mxu0 %v2031_v17  ;;  %1812 = vmatprep.subr.bf16.mxu1 %v2032_v18 }
 0x1fb   :  { %1346 = vmatpush1.bf16.msra.mxu0 %v2029_v19  ;;  %1813 = vmatpush3.bf16.msra.mxu1 %v2033_v20 }
 0x1fc   :  { %1347 = vmatprep.subr.bf16.mxu0 %v2036_v21 }
 0x1fe   :  { %1407 = vmatmul.mubr.bf16.vlgmr.msra.gmra.mrb[8].mxu1 %v2541_v52 }
 0x1ff   :  { %1348 = vmatpush1.bf16.msra.mxu0 %v2034_v22 }
 0x200   :  { %1349 = vmatprep.subr.bf16.mxu0 %v2039_v23 }
 0x203   :  { %1350 = vmatpush1.bf16.msra.mxu0 %v2037_v24 }
 0x204   :  { %1351 = vmatprep.subr.bf16.mxu0 %v2042_v25 }
 0x207   :  { %1352 = vmatpush1.bf16.msra.mxu0 %v2040_v26 }
 0x208   :  { %1353 = vmatprep.subr.bf16.mxu0 %v2045_v27 }
 0x20b   :  { %1354 = vmatpush1.bf16.msra.mxu0 %v2043_v28 }
 0x20c   :  { %1355 = vmatprep.subr.bf16.mxu0 %v2048_v29 }
 0x20f   :  { %1356 = vmatpush1.bf16.msra.mxu0 %v2046_v30 }
 0x210   :  { %1357 = vmatprep.subr.bf16.mxu0 %v2051_v31 }
 0x213   :  { %1358 = vmatpush1.bf16.msra.mxu0 %v2049_v32 }
 0x214   :  { %1359 = vmatprep.subr.bf16.mxu0 %v2054_v33 }
 0x217   :  { %1360 = vmatpush1.bf16.msra.mxu0 %v2052_v34 }
 0x218   :  { %1361 = vmatprep.subr.bf16.mxu0 %v2057_v35 }
 0x21b   :  { %1362 = vmatpush1.bf16.msra.mxu0 %v2055_v36 }
 0x21e   :  { %1364 = vmatmul.mubr.bf16.vlgmr.msra.gmra.mrb[8].mxu0 %v2541_v52 }
 0x2b1   :  { %v1279_v46 = vpop.f32.mrb[4].mxu0  ;;  %v1322_v47 = vpop.f32.mrb[4].mxu1 }
 0x2b2   :  { %v1280_v48 = vadd.f32 %v1279_v46, %v637_v40  ;;  %v1323_v49 = vadd.f32 %v1322_v47, %v645_v41  ;;  %v1281_v50 = vpop.f32.mrb[5].mxu0  ;;  %v1324_v51 = vpop.f32.mrb[5].mxu1 }
 0x2b3   :  { %v1282_v52 = vadd.f32 %v1281_v50, %v641_v43  ;;  %v1325_v53 = vadd.f32 %v1324_v51, %v649_v45  ;;  %v1283_v54 = vpop.f32.mrb[6].mxu0  ;;  %v1326_v55 = vpop.f32.mrb[6].mxu1 }
 0x2b4   :  { %2058 = vtanh.f32 %v1280_v48  ;;  %v1284_v56 = vadd.f32 %v1283_v54, %v637_v40  ;;  %v1285_v42 = vpop.f32.mrb[7].mxu0  ;;  %v1328_v57 = vpop.f32.mrb[7].mxu1  ;;  %v1327_v58 = vadd.f32 %v1326_v55, %v645_v41  ;;  %v660_v40 = vsub.s32 6, %v2180_v12 }
 0x2b5   :  { %2060 = vtanh.f32 %v1323_v49  ;;  %v1286_v44 = vadd.f32 %v1285_v42, %v641_v43  ;;  %v1329_v61 = vadd.f32 %v1328_v57, %v649_v45  ;;  %v652_v43 = vsub.s32 4, %v2180_v12 }
 0x2b6   :  { %2062 = vtanh.f32 %v1282_v52  ;;  %v661_v41 = vrot.slane %v2689_v38, %v660_v40  ;;  %v656_v45 = vsub.s32 5, %v2180_v12 }
 0x2b7   :  { %2064 = vtanh.f32 %v1325_v53  ;;  %v653_v47 = vrot.slane %v2689_v38, %v652_v43 }
 0x2b8   :  { %2066 = vtanh.f32 %v1284_v56  ;;  %v657_v49 = vrot.slane %v2689_v38, %v656_v45 }
 0x2b9   :  { %2068 = vtanh.f32 %v1327_v58 }
 0x2ba   :  { %2070 = vtanh.f32 %v1286_v44 }
 0x2bb   :  { %2072 = vtanh.f32 %v1329_v61 }
 0x2be   :  { %v2059_v63 = vpop.eup %2058 }
 0x2bf   :  { %v2061_v0 = vpop.eup %2060 }
 0x2c0   :  { %v2063_v2 = vpop.eup %2062 }
 0x2c1   :  { %v2065_v3 = vpop.eup %2064  ;;  %v1443_v4 = vcombine.low %v2059_v63, %v2063_v2  ;;  %v1444_v5 = vcombine.high %v2059_v63, %v2063_v2 }
 0x2c2   :  { %v2067_v6 = vpop.eup %2066  ;;  %v1445_v7 = vcombine.low %v2061_v0, %v2065_v3  ;;  %v1446_v8 = vcombine.high %v2061_v0, %v2065_v3 }
 0x2c3   :  { %v2069_v9 = vpop.eup %2068  ;;  %v1453_v10 = vrot.slane %v1443_v4, %v2699_v1  ;;  %v1460_v11 = vrot.slane %v1444_v5, %v2699_v1 }
 0x2c4   :  { %v2071_v13 = vpop.eup %2070  ;;  %v1467_v14 = vrot.slane %v1445_v7, %v2699_v1  ;;  %v1474_v15 = vrot.slane %v1446_v8, %v2699_v1 }
 0x2c5   :  { %v2073_v16 = vpop.eup %2072  ;;  %v1514_v17 = vcombine.low %v2067_v6, %v2071_v13  ;;  %v1515_v18 = vcombine.high %v2067_v6, %v2071_v13 }
 0x2c6   :  { %v1475_v19 = vcombine.low %v1453_v10, %v1467_v14  ;;  %v1476_v20 = vcombine.high %v1453_v10, %v1467_v14  ;;  %v1477_v21 = vcombine.low %v1460_v11, %v1474_v15  ;;  %v1478_v22 = vcombine.high %v1460_v11, %v1474_v15 }
 0x2c7   :  { %v1524_v23 = vrot.slane %v1514_v17, %v2699_v1  ;;  %v1531_v24 = vrot.slane %v1515_v18, %v2699_v1  ;;  %v1516_v25 = vcombine.low %v2069_v9, %v2073_v16  ;;  %v1517_v26 = vcombine.high %v2069_v9, %v2073_v16 }
 0x2c8   :  { %1601 = vst [vmem:[#allocation2] sm:$0xff] %v1475_v19  ;;  %1608 = vst [vmem:[#allocation2 + $0xe] sm:$0xff] %v1476_v20 }
 0x2c9   :  { %1610 = vst [vmem:[#allocation2 + $0x1c] sm:$0xff] %v1477_v21  ;;  %1612 = vst [vmem:[#allocation2 + $0x2a] sm:$0xff] %v1478_v22  ;;  %v1538_v27 = vrot.slane %v1516_v25, %v2699_v1  ;;  %v1545_v28 = vrot.slane %v1517_v26, %v2699_v1 }
 0x2cb   :  { %v1546_v29 = vcombine.low %v1524_v23, %v1538_v27  ;;  %v1547_v30 = vcombine.high %v1524_v23, %v1538_v27  ;;  %v1548_v31 = vcombine.low %v1531_v24, %v1545_v28  ;;  %v1549_v32 = vcombine.high %v1531_v24, %v1545_v28 }
 0x2cd   :  { %1614 = vst [vmem:[#allocation2 + $0x38] sm:$0xff] %v1546_v29  ;;  %1616 = vst [vmem:[#allocation2 + $0x46] sm:$0xff] %v1547_v30 }
 0x2ce   :  { %1618 = vst [vmem:[#allocation2 + $0x54] sm:$0xff] %v1548_v31  ;;  %1620 = vst [vmem:[#allocation2 + $0x62] sm:$0xff] %v1549_v32 }
 0x2d1   :  { %v1814_v33 = vpop.f32.mrb[8].mxu1 }
 0x2d2   :  { %v1815_v34 = vpop.f32.mrb[9].mxu1 }
 0x2d3   :  { %v1816_v35 = vadd.f32 %v1815_v34, %v1814_v33  ;;  %v1817_v36 = vpop.f32.mrb[10].mxu1 }
 0x2d4   :  { %v1818_v37 = vpop.f32.mrb[11].mxu1 }
 0x2d5   :  { %v1819_v39 = vadd.f32 %v1818_v37, %v1817_v36  ;;  %v1409_v46 = vadd.f32 %v1816_v35, %v661_v41 }
 0x2d7   :  { %v1412_v48 = vadd.f32 %v1819_v39, %v661_v41  ;;  %2074 = vtanh.f32 %v1409_v46 }
 0x2d9   :  { %2076 = vtanh.f32 %v1412_v48 }
 0x2e1   :  { %v2075_v12 = vpop.eup %2074 }
 0x2e2   :  { %v1481_v58 = vcombine.high %v2075_v12, %v2075_v12  ;;  %v1502_v63 = vrot.slane %v2075_v12, %v2699_v1 }
 0x2e3   :  { %v2077_v57 = vpop.eup %2076 }
 0x2e4   :  { %v1509_v0 = vrot.slane %v1481_v58, %v2699_v1  ;;  %v1552_v2 = vcombine.high %v2077_v57, %v2077_v57  ;;  %v1573_v13 = vrot.slane %v2077_v57, %v2699_v1 }
 0x2e6   :  { %v1580_v14 = vrot.slane %v1552_v2, %v2699_v1 }
 0x2f1   :  { %v1365_v50 = vpop.f32.mrb[8].mxu0 }
 0x2f2   :  { %v1366_v51 = vadd.f32 %v1365_v50, %v653_v47  ;;  %v1367_v52 = vpop.f32.mrb[9].mxu0 }
 0x2f3   :  { %v1368_v53 = vadd.f32 %v1367_v52, %v657_v49  ;;  %v1369_v54 = vpop.f32.mrb[10].mxu0 }
 0x2f4   :  { %2078 = vtanh.f32 %v1366_v51  ;;  %v1370_v55 = vadd.f32 %v1369_v54, %v653_v47  ;;  %v1371_v56 = vpop.f32.mrb[11].mxu0 }
 0x2f5   :  { %2080 = vtanh.f32 %v1368_v53  ;;  %v1372_v42 = vadd.f32 %v1371_v56, %v657_v49 }
 0x2f6   :  { %2082 = vtanh.f32 %v1370_v55 }
 0x2f7   :  { %2084 = vtanh.f32 %v1372_v42 }
 0x2fe   :  { %v2079_v38 = vpop.eup %2078 }
 0x2ff   :  { %v2081_v44 = vpop.eup %2080 }
 0x300   :  { %v2083_v59 = vpop.eup %2082  ;;  %v1479_v60 = vcombine.low %v2079_v38, %v2081_v44  ;;  %v1480_v61 = vcombine.high %v2079_v38, %v2081_v44 }
 0x301   :  { %v2085_v62 = vpop.eup %2084 }
 0x302   :  { %v1488_v3 = vrot.slane %v1479_v60, %v2699_v1  ;;  %v1495_v4 = vrot.slane %v1480_v61, %v2699_v1  ;;  %v1550_v5 = vcombine.low %v2083_v59, %v2085_v62  ;;  %v1551_v6 = vcombine.high %v2083_v59, %v2085_v62 }
 0x304   :  { %v1510_v8 = vcombine.low %v1488_v3, %v1502_v63  ;;  %v1511_v9 = vcombine.high %v1488_v3, %v1502_v63  ;;  %v1512_v10 = vcombine.low %v1495_v4, %v1509_v0  ;;  %v1513_v11 = vcombine.high %v1495_v4, %v1509_v0 }
 0x305   :  { %v1559_v15 = vrot.slane %v1550_v5, %v2699_v1  ;;  %v1566_v16 = vrot.slane %v1551_v6, %v2699_v1 }
 0x306   :  { %1607 = vst.msk [vmem:[#allocation2 + $0x8] sm:$0x3f] %vm2719_vm4, %v1510_v8  ;;  %1609 = vst.msk [vmem:[#allocation2 + $0x16] sm:$0x3f] %vm2719_vm4, %v1511_v9 }
 0x307   :  { %1611 = vst.msk [vmem:[#allocation2 + $0x24] sm:$0x3f] %vm2719_vm4, %v1512_v10  ;;  %1613 = vst.msk [vmem:[#allocation2 + $0x32] sm:$0x3f] %vm2719_vm4, %v1513_v11  ;;  %v1581_v17 = vcombine.low %v1559_v15, %v1573_v13  ;;  %v1582_v18 = vcombine.high %v1559_v15, %v1573_v13  ;;  %v1583_v19 = vcombine.low %v1566_v16, %v1580_v14 }
 0x308   :  { %v1584_v20 = vcombine.high %v1566_v16, %v1580_v14 }
 0x309   :  { %1615 = vst.msk [vmem:[#allocation2 + $0x40] sm:$0x3f] %vm2719_vm4, %v1581_v17  ;;  %1617 = vst.msk [vmem:[#allocation2 + $0x4e] sm:$0x3f] %vm2719_vm4, %v1582_v18 }
 0x30a   :  { %1619 = vst.msk [vmem:[#allocation2 + $0x5c] sm:$0x3f] %vm2719_vm4, %v1583_v19  ;;  %1621 = vst.msk [vmem:[#allocation2 + $0x6a] sm:$0x3f] %vm2719_vm4, %v1584_v20 }
 0x30b   :  { %1626 = vsyncadd [#allocation3], 1568  ;;  %s2113_s5 = smov [#allocation2]  }
 0x30c   :  { %s1627_s6 = sshll.u32 %s2113_s5, 4  ;;  %s1628_s6 = int_to_ptr.vmem [resolvable:$true] %s1627_s6 }
 0x30d   :  { %s2086_s25 = scalar_lea.vmem %s1628_s6, 224  ;;  %s2090_s26 = scalar_lea.vmem %s1628_s6, 1792 }
 0x30e   :  { %p2087_p0 = scmp.ne.s32.totalorder %s1628_s6, %s2086_s25  ;;  %p2091_p1 = scmp.lt.s32.totalorder %s1628_s6, %s1628_s6 }
 0x30f   :  { %p2092_p2 = scmp.lt.s32.totalorder %s2090_s26, %s2086_s25 }
 0x311   :  { %p2093_p3 = por %p2092_p2, %p2091_p1 }
 0x313   :  { %p2094_p4 = pnand %p2093_p3, %p2087_p0 }
 0x315   :  { %2097 = shalt.err (!%p2094_p4)
}
 0x316   :  { %s2098_s28 = scalar_lea.hbm %s2762_s7, 224 }
 0x317   :  { %p2099_p5 = scmp.ne.s32.totalorder %s2762_s7, %s2098_s28  ;;  %p2102_p6 = scmp.lt.u32.totalorder %s2098_s28, %s2762_s7 }
 0x319   :  { %p2104_p7 = pnand %p2102_p6, %p2099_p5 }
 0x31b   :  { %2107 = shalt.err (!%p2104_p7)
}
 0x31c   :  { %s2114_s10 = smov 224   ;;  %s2115_s11 = smov 14  }
 0x31d   :  { %1633 = dma.vmem_to_hbm [thread:$0]  %s1628_s6, 224, %s2762_s7, [#allocation3], %s2114_s10, %s2114_s10, %s2115_s11  }
 0x31e   :  { %2108 = dma.done.wait [#allocation3], 1792  }
 0x31f   :  { %2109 = vsyncadd [#allocation3], 4294965504 }
 0x320   :  { %1637 = vsyncpa [#allocation3], 1 }

</bundles_post_ra>
